<compile_context>
chip_gen: v6e
topology: v6e:2x2x1
jax: 0.10.0
libtpu: 0.0.40
codegen_flags: <defaults>
</compile_context>

<pallas_src>
import jax
import jax.numpy as jnp
from jax.experimental import pallas as pl
from jax.experimental.pallas import tpu as pltpu

PAD_IDX = 0
VOCAB = 50
EMB_DIM = 16
BATCH = 2
MAX_DOC_LEN = 6
MAX_SEN_LEN = 8

LANES = 128  # TPU lane width


def _embedding_kernel(tok_ref, embT_ref, outT_ref):
    """Embedding gather as a transposed one-hot MXU matmul (lane-dense layout).

    tok_ref  : [1, Np]  int32    flattened token ids, lane-dense row (Np = 128k)
    embT_ref : [E, V]   float32  embedding table, pre-transposed (row PAD_IDX zero)
    outT_ref : [E, Np]  float32  gathered embeddings, transposed (lane-dense)
    """
    v = embT_ref.shape[1]
    n_pad = tok_ref.shape[1]
    # one_hot_T[j, i] = (tokens[i] == j).  The single token row broadcasts
    # across sublanes; the iota runs down the sublane axis.
    vocab_ids = jax.lax.broadcasted_iota(jnp.int32, (v, n_pad), 0)     # [V, Np]
    one_hot_t = (vocab_ids == tok_ref[...]).astype(jnp.float32)        # [V, Np]
    # [E, V] x [V, Np] -> [E, Np].  0/1 one-hot values make the gather exact
    # (1*x + exact zeros); output tile is lane-full so stores are unmasked.
    outT_ref[...] = jnp.dot(embT_ref[...], one_hot_t,
                            preferred_element_type=jnp.float32)


def token_embedding(emb_table, tokens):
    """tokens [B, D, S] int -> [B, D, S, E] float32 (== nn.Embedding forward)."""
    b, d, s = tokens.shape
    v, e = emb_table.shape
    n = b * d * s
    # Lane-dense token layout: pad N to a multiple of 128 lanes once in the
    # wrapper (pad slots hold PAD_IDX, a valid id; their columns are sliced off).
    n_pad = ((n + LANES - 1) // LANES) * LANES
    tok_row = jnp.full((1, n_pad), PAD_IDX, dtype=jnp.int32)
    tok_row = tok_row.at[0, :n].set(tokens.reshape(n).astype(jnp.int32))
    # Pre-transpose the tiny (VxE) table so the in-kernel product is directly
    # lane-dense; done once in the wrapper, outside the kernel.
    emb_t = emb_table.T                                                # [E, V]

    out_t = pl.pallas_call(
        _embedding_kernel,
        out_shape=jax.ShapeDtypeStruct((e, n_pad), jnp.float32),
        # grid=() : single launch, everything resident in VMEM for its duration.
        in_specs=[pl.BlockSpec(memory_space=pltpu.MemorySpace.VMEM),
                  pl.BlockSpec(memory_space=pltpu.MemorySpace.VMEM)],
        out_specs=pl.BlockSpec(memory_space=pltpu.MemorySpace.VMEM),
    )(tok_row, emb_t)

    # Metadata/XLA-side slice + transpose + reshape back to [B, D, S, E].
    return out_t[:, :n].T.reshape(b, d, s, e)


def init_embedding_table(key):
    # nn.Embedding-style init (scaled f32 normal); padding_idx row zeroed,
    # matching PyTorch's padding_idx behaviour.
    w = 0.1 * jax.random.normal(key, (VOCAB, EMB_DIM), dtype=jnp.float32)
    return w.at[PAD_IDX].set(0.0)


if __name__ == "__main__":
    key = jax.random.PRNGKey(0)
    k_emb, k_tok = jax.random.split(key)

    emb_table = init_embedding_table(k_emb)
    tokens = jax.random.randint(
        k_tok, (BATCH, MAX_DOC_LEN, MAX_SEN_LEN), 0, VOCAB, dtype=jnp.int32)

    fwd = jax.jit(token_embedding)
    out = jax.block_until_ready(fwd(emb_table, tokens))
    assert out.shape == (BATCH, MAX_DOC_LEN, MAX_SEN_LEN, EMB_DIM)

    # Reference: plain lookup (what nn.Embedding.forward computes).
    ref = jnp.take(emb_table, tokens, axis=0)
    err = float(jnp.max(jnp.abs(out - ref)))
    if err > 1e-6:
        raise RuntimeError(f"Pallas output mismatch vs reference, max abs err = {err}")

    # padding_idx rows must be exactly zero.
    pad_mask = (tokens == PAD_IDX)[..., None]
    pad_err = float(jnp.max(jnp.where(pad_mask, jnp.abs(out), 0.0)))
    if pad_err != 0.0:
        raise RuntimeError(f"padding_idx embeddings are non-zero (max {pad_err})")

    print("KERNEL_OK")
</pallas_src>

<mosaic_0001>
module attributes {stable_mosaic.version = 11 : i64} {
  func.func @_embedding_kernel(%arg0: memref<1x128xi32, #tpu.memory_space<vmem>>, %arg1: memref<16x50xf32, #tpu.memory_space<vmem>>, %arg2: memref<16x128xf32, #tpu.memory_space<vmem>>) attributes {dimension_semantics = [], scalar_prefetch = 0 : i64, scratch_operands = 0 : i64, tpu.core_type = #tpu.core_type<tc>} {
    %0 = tpu.iota {dimensions = array<i32: 0>} : vector<50x128xi32>
    %c0 = arith.constant 0 : index
    %c0_0 = arith.constant 0 : index
    %1 = vector.load %arg0[%c0, %c0_0] : memref<1x128xi32, #tpu.memory_space<vmem>>, vector<1x128xi32>
    %2 = vector.broadcast %1 : vector<1x128xi32> to vector<50x128xi32>
    %3 = arith.cmpi eq, %0, %2 : vector<50x128xi32>
    %4 = arith.extui %3 : vector<50x128xi1> to vector<50x128xi32>
    %5 = arith.sitofp %4 : vector<50x128xi32> to vector<50x128xf32>
    %c0_1 = arith.constant 0 : index
    %c0_2 = arith.constant 0 : index
    %6 = vector.load %arg1[%c0_1, %c0_2] : memref<16x50xf32, #tpu.memory_space<vmem>>, vector<16x50xf32>
    %cst = arith.constant dense<0.000000e+00> : vector<16x128xf32>
    %7 = tpu.matmul %6, %5, %cst {dimension_numbers = #tpu.dot_dimension_numbers<[1], [0], [0], [1], [0, 0, 1, 1], [], []>} : vector<16x50xf32>, vector<50x128xf32>, vector<16x128xf32> -> vector<16x128xf32>
    %c0_3 = arith.constant 0 : index
    %c0_4 = arith.constant 0 : index
    %8 = vector.load %arg2[%c0_3, %c0_4] : memref<16x128xf32, #tpu.memory_space<vmem>>, vector<16x128xf32>
    tpu.vector_store %arg2[%c0_3, %c0_4], %7 {strides = array<i32>} : memref<16x128xf32, #tpu.memory_space<vmem>>, vector<16x128xf32>,
    return
  }
}

</mosaic_0001>

<bundles_post_ra>
// kernel: token_embedding.1
= control target key start
LH: loop header
LB: loop body
LE: loop exit
PB: predicated region body
PF: predicated region fallthrough
CT: control target
= control target key end

     0   :  { %v11_v0 = vlaneseq  ;;  %vm47_vm0 = vcmask 408576   ;;  %vm54_vm1 = vcmask 1041408   ;;  %v184_v7 = vmov 0.0   ;;  %s218_s0 = inlined_call_operand.vmem [shape: s32[1,128], index: 0, kind: input, shape index: {}]   ;;  %s219_s1 = inlined_call_operand.vmem [shape: f32[16,50], index: 1, kind: input, shape index: {}]   ;;  %s220_s2 = inlined_call_operand.vmem [shape: f32[16,128], index: 2, kind: output, shape index: {}]  }
   0x1   :  { %v45_v1 = vld [vmem:[%s219_s1] sm:$0xff]  ;;  %v185_v11 = vmov 1.0   ;;  %v46_v13 = vld [vmem:[%s219_s1 + $0x8] sm:$0xff] }
   0x2   :  { %v12_v2 = vshrl.u32 %v11_v0, 7  ;;  %179 = vmatprep.mubr.msk.f32.mxu0 %vm47_vm0, %v45_v1  ;;  %v139_v3 = vld [vmem:[%s218_s0] ss:$0 sm:$0xff] }
   0x4   :  { %v18_v4 = vadd.s32 48, %v12_v2  ;;  %v17_v5 = vadd.s32 40, %v12_v2  ;;  %v16_v6 = vadd.s32 32, %v12_v2  ;;  %v15_v9 = vadd.s32 24, %v12_v2 }
   0x5   :  { %v14_v10 = vadd.s32 16, %v12_v2  ;;  %v13_v12 = vadd.s32 8, %v12_v2  ;;  %vm24_vm8 = vcmp.eq.s32.totalorder %v12_v2, %v139_v3 }
   0x6   :  { %vm30_vm2 = vcmp.eq.s32.totalorder %v18_v4, %v139_v3  ;;  %vm29_vm3 = vcmp.eq.s32.totalorder %v17_v5, %v139_v3  ;;  %vm28_vm4 = vcmp.eq.s32.totalorder %v16_v6, %v139_v3  ;;  %vm27_vm5 = vcmp.eq.s32.totalorder %v15_v9, %v139_v3 }
   0x7   :  { %v146_v8 = vsel %vm30_vm2, 1.0, %v184_v7  ;;  %vm26_vm6 = vcmp.eq.s32.totalorder %v14_v10, %v139_v3  ;;  %vm25_vm7 = vcmp.eq.s32.totalorder %v13_v12, %v139_v3 }
   0x8   :  { %165 = vmatprep.subr.msk.mxu0 %vm54_vm1, %v146_v8 }
   0x9   :  { %166 = vmatpush3.msk.msra.mxu0 %vm54_vm1, %v146_v8 }
   0xa   :  { %167 = vmatprep.subr.msk.mxu0 %vm29_vm3, %v185_v11 }
   0xb   :  { %168 = vmatpush3.msk.msra.mxu0 %vm29_vm3, %v185_v11 }
   0xc   :  { %169 = vmatprep.subr.msk.mxu0 %vm28_vm4, %v185_v11 }
   0xd   :  { %170 = vmatpush3.msk.msra.mxu0 %vm28_vm4, %v185_v11 }
   0xe   :  { %171 = vmatprep.subr.msk.mxu0 %vm27_vm5, %v185_v11 }
   0xf   :  { %172 = vmatpush3.msk.msra.mxu0 %vm27_vm5, %v185_v11 }
  0x10   :  { %173 = vmatprep.subr.msk.mxu0 %vm26_vm6, %v185_v11 }
  0x11   :  { %174 = vmatpush3.msk.msra.mxu0 %vm26_vm6, %v185_v11 }
  0x12   :  { %175 = vmatprep.subr.msk.mxu0 %vm25_vm7, %v185_v11 }
  0x13   :  { %176 = vmatpush3.msk.msra.mxu0 %vm25_vm7, %v185_v11 }
  0x14   :  { %177 = vmatprep.subr.msk.mxu0 %vm24_vm8, %v185_v11 }
  0x15   :  { %178 = vmatpush3.msk.msra.mxu0 %vm24_vm8, %v185_v11 }
  0x16   :  { %180 = vmatmul.mubr.msk.f32.vlgmr.msra.gmra.mxu0 %vm47_vm0, %v46_v13 }
  0xd6   :  { %v181_v14 = vpop.f32.mrf.mxu0 }
  0xd7   :  { %134 = vst [vmem:[%s220_s2 + $0x8] sm:$0xff] %v181_v14 }
  0xd8   :  { %v124_v15 = vpop.f32.mrf.mxu0 }
  0xd9   :  { %133 = vst [vmem:[%s220_s2] sm:$0xff] %v124_v15 }

</bundles_post_ra>
